<compile_context>
chip_gen: v6e
topology: v6e:2x2x1
jax: 0.10.0
libtpu: 0.0.40
codegen_flags: <defaults>
</compile_context>

<pallas_src>
import jax
import jax.numpy as jnp
from jax import lax
from jax.experimental import pallas as pl
from jax.experimental.pallas import tpu as pltpu

# ---- problem sizes (small, consistent with getout logic states) -------------
B = 2                # batch (environments per step) for the small demo
N_OBJ = 4            # objects per state
N_FEAT = 6           # features per object (type one-hot + x + y)
IN_DIM = N_OBJ * N_FEAT
N_ATOMS = 64         # ground atoms in the logic language (real)
N_ACTIONS = 3        # getout action predicates (jump / left / right)
ACTION_ATOMS = (5, 17, 29)   # static atom indices of the action predicates
T_INFER = 4          # forward-chaining steps
CRITIC_HIDDEN = 32

OUT_LANES = 128              # lane-dense width: padded atoms AND output slab
MAX_TILE_B = 256             # batch tile (128-512 recommended); blocks stay tiny

COL_VALUE = N_ACTIONS            # slab col 3
COL_LOGP = N_ACTIONS + 1         # slab cols 4..6
COL_ACTION = COL_LOGP + N_ACTIONS        # col 7
COL_ALOGP = COL_ACTION + 1               # col 8
COL_ENTROPY = COL_ALOGP + 1              # col 9


# ------------------------------- fused kernel --------------------------------
def _fused_kernel(state_ref, wfused_ref, bfused_ref, winf_ref, sel_ref,
                  cw2_ref, cb2_ref, out_ref):
    x = state_ref[...]                                     # (tile, IN_DIM) f32

    # ---- one MXU pass for [valuation | critic hidden | zero pad] -----------
    # (the /50 getout position scaling is pre-folded into the valuation cols)
    combined = (jnp.dot(x, wfused_ref[...], preferred_element_type=jnp.float32)
                + bfused_ref[...])                         # (tile, 128)
    lane = lax.broadcasted_iota(jnp.int32, combined.shape, 1)
    lane_f = lane.astype(jnp.float32)

    # valuation vector, lane-dense 128 wide; padded lanes forced to 0
    v = jnp.where(lane < N_ATOMS, jax.nn.sigmoid(combined), 0.0)

    # ---- T differentiable forward-chaining steps: softor(v, sigmoid(v@W)) ---
    # winf has exactly-zero rows for padded atoms, so the 0.5 values that the
    # sigmoid puts in padded lanes never influence real atoms.
    winf = winf_ref[...]                                   # (128, 128)
    for _ in range(T_INFER):
        c = jax.nn.sigmoid(jnp.dot(v, winf, preferred_element_type=jnp.float32))
        v = v + c - v * c

    # ---- critic: MLPGetout(out_size=1, logic=True) -------------------------
    # ReLU of the shared matmul, dotted with a lane-padded second-layer weight
    value = (jnp.sum(jnp.maximum(combined, 0.0) * cw2_ref[...],
                     axis=-1, keepdims=True)
             + cb2_ref[...])                               # (tile, 1)

    # ---- get_predictions via one static one-hot selector matmul (MXU) ------
    # lanes 0..2 = raw action-atom values, lanes 4..6 = same values (for logp)
    sel = jnp.dot(v, sel_ref[...], preferred_element_type=jnp.float32)

    is_prob = lane < N_ACTIONS
    total = jnp.sum(jnp.where(is_prob, sel, 0.0), axis=-1, keepdims=True)
    total_safe = jnp.maximum(total, 1e-12)
    inv = 1.0 / total_safe                                 # exact reciprocal
    log_total = jnp.log(total_safe)

    probs_all = sel * inv                                  # lanes 0..2 (and 4..6)
    logp_all = jnp.log(jnp.maximum(sel, 1e-20)) - log_total

    # greedy action = first lane attaining the max raw prob (torch tie rule)
    pmax = jnp.max(jnp.where(is_prob, sel, -1e30), axis=-1, keepdims=True)
    is_max = (sel == pmax) & is_prob
    action_idx = jnp.min(jnp.where(is_max, lane_f, 1e9), axis=-1, keepdims=True)
    action_logp = jnp.log(jnp.maximum(pmax, 1e-20)) - log_total
    entropy = -jnp.sum(jnp.where(is_prob, probs_all * logp_all, 0.0),
                       axis=-1, keepdims=True)

    # ---- single lane-dense (tile, 128) unmasked store -----------------------
    slab = jnp.where((lane >= COL_LOGP) & (lane < COL_LOGP + N_ACTIONS),
                     logp_all, probs_all)
    slab = jnp.where(lane == COL_VALUE, value, slab)
    slab = jnp.where(lane == COL_ACTION, action_idx, slab)
    slab = jnp.where(lane == COL_ALOGP, action_logp, slab)
    slab = jnp.where(lane == COL_ENTROPY, entropy, slab)
    out_ref[...] = slab


# ------------------------------- wrappers ------------------------------------
def _round_up(n, m):
    return ((n + m - 1) // m) * m


def _full(shape):
    # whole-array block, same block for every grid step
    return pl.BlockSpec(shape, lambda i: (0,) * len(shape))


@jax.jit
def fused_forward(state_flat, params):
    """state_flat: (n, IN_DIM) -> lane-dense slab (n, OUT_LANES)."""
    n = state_flat.shape[0]
    # static tile choice: big tiles amortize the ~0.35us/step overhead and fill
    # the MXU M dimension once the caller batches environments; small batches
    # just round up to the 8-row sublane granule.
    tile = min(MAX_TILE_B, _round_up(n, 8))
    n_pad = _round_up(n, tile)

    x = state_flat.astype(jnp.float32)
    if n_pad != n:                       # skip the pad entirely when aligned
        x = jnp.pad(x, ((0, n_pad - n), (0, 0)))

    slab = pl.pallas_call(
        _fused_kernel,
        out_shape=jax.ShapeDtypeStruct((n_pad, OUT_LANES), jnp.float32),
        grid=(n_pad // tile,),
        in_specs=[
            pl.BlockSpec((tile, IN_DIM), lambda i: (i, 0)),
            _full((IN_DIM, OUT_LANES)),          # fused [w_val | c_w1 | 0]
            _full((1, OUT_LANES)),               # fused [b_val | c_b1 | 0]
            _full((OUT_LANES, OUT_LANES)),       # padded inference matrix
            _full((OUT_LANES, OUT_LANES)),       # action-atom selector
            _full((1, OUT_LANES)),               # padded critic layer-2 weight
            _full((1, 1)),                       # critic layer-2 bias
        ],
        out_specs=pl.BlockSpec((tile, OUT_LANES), lambda i: (i, 0)),
        compiler_params=pltpu.CompilerParams(
            dimension_semantics=("parallel",)    # batch tiles shard across TCs
        ),
    )(x, params["w_fused"], params["b_fused"], params["w_inf"],
      params["selector"], params["c_w2"], params["c_b2"])
    return slab[:n]


def act(logic_state, params):
    """Greedy (epsilon=0.0) branch of NSFR_PI_ActorCritic.act + critic value.

    Matches the torch semantics of using the first batch element's
    distribution for the action; per-env probs/values are returned for all rows.
    If act() is driven per-step from a Python rollout loop, wrap the loop in
    lax.scan around fused_forward to amortize dispatch + weight DMA.
    """
    flat = logic_state.reshape(logic_state.shape[0], IN_DIM)
    slab = fused_forward(flat, params)
    probs = slab[:, :N_ACTIONS]                            # (n, 3)
    value = slab[:, COL_VALUE:COL_VALUE + 1]               # (n, 1)
    action = slab[0, COL_ACTION].astype(jnp.int32)         # greedy, computed in-kernel
    action_logprob = slab[0, COL_ALOGP]
    return action, action_logprob, probs, value


def init_params(key):
    ks = jax.random.split(key, 5)
    w_val = 0.1 * jax.random.normal(ks[0], (IN_DIM, N_ATOMS), jnp.float32)
    # Fold the getout normalization logic_state[:, :, -2:] /= 50 into the
    # valuation weights: pre-matmul feature scaling == row scaling of W.
    # (assumes the caller passes RAW, unnormalized positions)
    feat_idx = jnp.arange(IN_DIM) % N_FEAT
    pos_scale = jnp.where(feat_idx >= N_FEAT - 2, 1.0 / 50.0, 1.0)
    w_val = w_val * pos_scale[:, None]
    b_val = 0.1 * jax.random.normal(ks[1], (1, N_ATOMS), jnp.float32)
    w_inf = 0.1 * jax.random.normal(ks[2], (N_ATOMS, N_ATOMS), jnp.float32)
    c_w1 = 0.1 * jax.random.normal(ks[3], (IN_DIM, CRITIC_HIDDEN), jnp.float32)
    c_b1 = jnp.zeros((1, CRITIC_HIDDEN), jnp.float32)
    c_w2 = 0.1 * jax.random.normal(ks[4], (1, CRITIC_HIDDEN), jnp.float32)
    c_b2 = jnp.zeros((1, 1), jnp.float32)

    assert max(ACTION_ATOMS) < N_ATOMS  # padded atoms must never be actions

    # ---- lane-dense 128-wide packing / padding ------------------------------
    # fused first-layer weight: [ w_val (64) | c_w1 (32) | zeros (32) ]
    w_fused = jnp.zeros((IN_DIM, OUT_LANES), jnp.float32)
    w_fused = w_fused.at[:, :N_ATOMS].set(w_val)
    w_fused = w_fused.at[:, N_ATOMS:N_ATOMS + CRITIC_HIDDEN].set(c_w1)
    b_fused = jnp.zeros((1, OUT_LANES), jnp.float32)
    b_fused = b_fused.at[:, :N_ATOMS].set(b_val)
    b_fused = b_fused.at[:, N_ATOMS:N_ATOMS + CRITIC_HIDDEN].set(c_b1)
    # inference matrix padded to 128x128; padded rows/cols are exactly zero
    w_inf_pad = jnp.zeros((OUT_LANES, OUT_LANES), jnp.float32)
    w_inf_pad = w_inf_pad.at[:N_ATOMS, :N_ATOMS].set(w_inf)
    # static one-hot selector: action atom j -> output lanes j and COL_LOGP+j
    selector = jnp.zeros((OUT_LANES, OUT_LANES), jnp.float32)
    for j, a in enumerate(ACTION_ATOMS):
        selector = selector.at[a, j].set(1.0)
        selector = selector.at[a, COL_LOGP + j].set(1.0)
    # critic second-layer weight aligned to lanes 64..95 of the fused matmul
    c_w2_pad = jnp.zeros((1, OUT_LANES), jnp.float32)
    c_w2_pad = c_w2_pad.at[:, N_ATOMS:N_ATOMS + CRITIC_HIDDEN].set(c_w2)

    return dict(w_fused=w_fused, b_fused=b_fused, w_inf=w_inf_pad,
                selector=selector, c_w2=c_w2_pad, c_b2=c_b2)


if __name__ == "__main__":
    key = jax.random.PRNGKey(0)
    k_state, k_param, k_big = jax.random.split(key, 3)
    params = init_params(k_param)

    # getout-style logic state: (B, n_obj, n_feat); last two feats are raw
    # positions in [0, 50) (the /50 normalization is folded into the weights)
    logic_state = jax.random.uniform(k_state, (B, N_OBJ, N_FEAT), jnp.float32) * 50.0

    action, logprob, probs, value = act(logic_state, params)
    jax.block_until_ready((action, logprob, probs, value))

    assert probs.shape == (B, N_ACTIONS)
    assert value.shape == (B, 1)
    assert bool(jnp.all(jnp.isfinite(probs)))
    assert bool(jnp.all(jnp.isfinite(value)))
    assert bool(jnp.all(jnp.isfinite(logprob)))
    assert bool(jnp.allclose(jnp.sum(probs, axis=-1), 1.0, atol=1e-3))
    assert 0 <= int(action) < N_ACTIONS

    # batched-rollout path: 512 envs -> two 256-row tiles, no padding, grid=(2,)
    big_state = jax.random.uniform(k_big, (512, N_OBJ, N_FEAT), jnp.float32) * 50.0
    big_slab = fused_forward(big_state.reshape(512, IN_DIM), params)
    jax.block_until_ready(big_slab)
    assert bool(jnp.all(jnp.isfinite(big_slab)))
    assert bool(jnp.allclose(jnp.sum(big_slab[:, :N_ACTIONS], axis=-1), 1.0, atol=1e-3))

    print("KERNEL_OK")
</pallas_src>

<mosaic_0001>
module attributes {stable_mosaic.version = 11 : i64} {
  func.func @_fused_kernel(%arg0: i32, %arg1: memref<8x24xf32, #tpu.memory_space<vmem>>, %arg2: memref<24x128xf32, #tpu.memory_space<vmem>>, %arg3: memref<1x128xf32, #tpu.memory_space<vmem>>, %arg4: memref<128x128xf32, #tpu.memory_space<vmem>>, %arg5: memref<128x128xf32, #tpu.memory_space<vmem>>, %arg6: memref<1x128xf32, #tpu.memory_space<vmem>>, %arg7: memref<1x1xf32, #tpu.memory_space<vmem>>, %arg8: memref<8x128xf32, #tpu.memory_space<vmem>>) attributes {dimension_semantics = [#tpu.dimension_semantics<parallel>], iteration_bounds = array<i64: 1>, scalar_prefetch = 0 : i64, scratch_operands = 0 : i64, tpu.core_type = #tpu.core_type<tc>, window_params = [{transform_indices = @transform_0, window_bounds = array<i64: 8, 24>}, {pipeline_mode = #tpu.pipeline_mode<synchronous>, transform_indices = @transform_1, window_bounds = array<i64: 24, 128>}, {pipeline_mode = #tpu.pipeline_mode<synchronous>, transform_indices = @transform_2, window_bounds = array<i64: 1, 128>}, {pipeline_mode = #tpu.pipeline_mode<synchronous>, transform_indices = @transform_3, window_bounds = array<i64: 128, 128>}, {pipeline_mode = #tpu.pipeline_mode<synchronous>, transform_indices = @transform_4, window_bounds = array<i64: 128, 128>}, {pipeline_mode = #tpu.pipeline_mode<synchronous>, transform_indices = @transform_5, window_bounds = array<i64: 1, 128>}, {pipeline_mode = #tpu.pipeline_mode<synchronous>, transform_indices = @transform_6, window_bounds = array<i64: 1, 1>}, {transform_indices = @transform_7, window_bounds = array<i64: 8, 128>}]} {
    %c0 = arith.constant 0 : index
    %c0_0 = arith.constant 0 : index
    %0 = vector.load %arg1[%c0, %c0_0] : memref<8x24xf32, #tpu.memory_space<vmem>>, vector<8x24xf32>
    %c0_1 = arith.constant 0 : index
    %c0_2 = arith.constant 0 : index
    %1 = vector.load %arg2[%c0_1, %c0_2] : memref<24x128xf32, #tpu.memory_space<vmem>>, vector<24x128xf32>
    %cst = arith.constant dense<0.000000e+00> : vector<8x128xf32>
    %2 = tpu.matmul %0, %1, %cst {dimension_numbers = #tpu.dot_dimension_numbers<[1], [0], [0], [1], [0, 0, 1, 1], [], []>} : vector<8x24xf32>, vector<24x128xf32>, vector<8x128xf32> -> vector<8x128xf32>
    %c0_3 = arith.constant 0 : index
    %c0_4 = arith.constant 0 : index
    %3 = vector.load %arg3[%c0_3, %c0_4] : memref<1x128xf32, #tpu.memory_space<vmem>>, vector<1x128xf32>
    %4 = vector.broadcast %3 : vector<1x128xf32> to vector<8x128xf32>
    %5 = arith.addf %2, %4 : vector<8x128xf32>
    %6 = tpu.iota {dimensions = array<i32: 1>} : vector<8x128xi32>
    %7 = arith.sitofp %6 : vector<8x128xi32> to vector<8x128xf32>
    %c64_i32 = arith.constant 64 : i32
    %8 = vector.broadcast %c64_i32 : i32 to vector<8x128xi32>
    %9 = arith.cmpi slt, %6, %8 : vector<8x128xi32>
    %10 = arith.negf %5 : vector<8x128xf32>
    %11 = math.exp %10 : vector<8x128xf32>
    %cst_5 = arith.constant 1.000000e+00 : f32
    %12 = vector.broadcast %cst_5 : f32 to vector<8x128xf32>
    %13 = arith.addf %12, %11 : vector<8x128xf32>
    %14 = arith.divf %12, %13 : vector<8x128xf32>
    %cst_6 = arith.constant 0.000000e+00 : f32
    %15 = vector.broadcast %cst_6 : f32 to vector<8x128xf32>
    %16 = arith.select %9, %14, %15 : vector<8x128xi1>, vector<8x128xf32>
    %c0_7 = arith.constant 0 : index
    %c0_8 = arith.constant 0 : index
    %17 = vector.load %arg4[%c0_7, %c0_8] : memref<128x128xf32, #tpu.memory_space<vmem>>, vector<128x128xf32>
    %cst_9 = arith.constant dense<0.000000e+00> : vector<8x128xf32>
    %18 = tpu.matmul %16, %17, %cst_9 {dimension_numbers = #tpu.dot_dimension_numbers<[1], [0], [0], [1], [0, 0, 1, 1], [], []>} : vector<8x128xf32>, vector<128x128xf32>, vector<8x128xf32> -> vector<8x128xf32>
    %19 = arith.negf %18 : vector<8x128xf32>
    %20 = math.exp %19 : vector<8x128xf32>
    %cst_10 = arith.constant 1.000000e+00 : f32
    %21 = vector.broadcast %cst_10 : f32 to vector<8x128xf32>
    %22 = arith.addf %21, %20 : vector<8x128xf32>
    %23 = arith.divf %21, %22 : vector<8x128xf32>
    %24 = arith.addf %16, %23 : vector<8x128xf32>
    %25 = arith.mulf %16, %23 : vector<8x128xf32>
    %26 = arith.subf %24, %25 : vector<8x128xf32>
    %cst_11 = arith.constant dense<0.000000e+00> : vector<8x128xf32>
    %27 = tpu.matmul %26, %17, %cst_11 {dimension_numbers = #tpu.dot_dimension_numbers<[1], [0], [0], [1], [0, 0, 1, 1], [], []>} : vector<8x128xf32>, vector<128x128xf32>, vector<8x128xf32> -> vector<8x128xf32>
    %28 = arith.negf %27 : vector<8x128xf32>
    %29 = math.exp %28 : vector<8x128xf32>
    %cst_12 = arith.constant 1.000000e+00 : f32
    %30 = vector.broadcast %cst_12 : f32 to vector<8x128xf32>
    %31 = arith.addf %30, %29 : vector<8x128xf32>
    %32 = arith.divf %30, %31 : vector<8x128xf32>
    %33 = arith.addf %26, %32 : vector<8x128xf32>
    %34 = arith.mulf %26, %32 : vector<8x128xf32>
    %35 = arith.subf %33, %34 : vector<8x128xf32>
    %cst_13 = arith.constant dense<0.000000e+00> : vector<8x128xf32>
    %36 = tpu.matmul %35, %17, %cst_13 {dimension_numbers = #tpu.dot_dimension_numbers<[1], [0], [0], [1], [0, 0, 1, 1], [], []>} : vector<8x128xf32>, vector<128x128xf32>, vector<8x128xf32> -> vector<8x128xf32>
    %37 = arith.negf %36 : vector<8x128xf32>
    %38 = math.exp %37 : vector<8x128xf32>
    %cst_14 = arith.constant 1.000000e+00 : f32
    %39 = vector.broadcast %cst_14 : f32 to vector<8x128xf32>
    %40 = arith.addf %39, %38 : vector<8x128xf32>
    %41 = arith.divf %39, %40 : vector<8x128xf32>
    %42 = arith.addf %35, %41 : vector<8x128xf32>
    %43 = arith.mulf %35, %41 : vector<8x128xf32>
    %44 = arith.subf %42, %43 : vector<8x128xf32>
    %cst_15 = arith.constant dense<0.000000e+00> : vector<8x128xf32>
    %45 = tpu.matmul %44, %17, %cst_15 {dimension_numbers = #tpu.dot_dimension_numbers<[1], [0], [0], [1], [0, 0, 1, 1], [], []>} : vector<8x128xf32>, vector<128x128xf32>, vector<8x128xf32> -> vector<8x128xf32>
    %46 = arith.negf %45 : vector<8x128xf32>
    %47 = math.exp %46 : vector<8x128xf32>
    %cst_16 = arith.constant 1.000000e+00 : f32
    %48 = vector.broadcast %cst_16 : f32 to vector<8x128xf32>
    %49 = arith.addf %48, %47 : vector<8x128xf32>
    %50 = arith.divf %48, %49 : vector<8x128xf32>
    %51 = arith.addf %44, %50 : vector<8x128xf32>
    %52 = arith.mulf %44, %50 : vector<8x128xf32>
    %53 = arith.subf %51, %52 : vector<8x128xf32>
    %cst_17 = arith.constant 0.000000e+00 : f32
    %54 = vector.broadcast %cst_17 : f32 to vector<8x128xf32>
    %55 = arith.maximumf %5, %54 : vector<8x128xf32>
    %c0_18 = arith.constant 0 : index
    %c0_19 = arith.constant 0 : index
    %56 = vector.load %arg6[%c0_18, %c0_19] : memref<1x128xf32, #tpu.memory_space<vmem>>, vector<1x128xf32>
    %57 = vector.broadcast %56 : vector<1x128xf32> to vector<8x128xf32>
    %58 = arith.mulf %55, %57 : vector<8x128xf32>
    %cst_20 = arith.constant dense<0.000000e+00> : vector<8xf32>
    %59 = vector.multi_reduction <add>, %58, %cst_20 [1] : vector<8x128xf32> to vector<8xf32>
    %60 = vector.shape_cast %59 : vector<8xf32> to vector<8x1xf32>
    %c0_21 = arith.constant 0 : index
    %c0_22 = arith.constant 0 : index
    %61 = vector.load %arg7[%c0_21, %c0_22] : memref<1x1xf32, #tpu.memory_space<vmem>>, vector<1x1xf32>
    %62 = vector.broadcast %61 : vector<1x1xf32> to vector<8x1xf32>
    %63 = arith.addf %60, %62 : vector<8x1xf32>
    %c0_23 = arith.constant 0 : index
    %c0_24 = arith.constant 0 : index
    %64 = vector.load %arg5[%c0_23, %c0_24] : memref<128x128xf32, #tpu.memory_space<vmem>>, vector<128x128xf32>
    %cst_25 = arith.constant dense<0.000000e+00> : vector<8x128xf32>
    %65 = tpu.matmul %53, %64, %cst_25 {dimension_numbers = #tpu.dot_dimension_numbers<[1], [0], [0], [1], [0, 0, 1, 1], [], []>} : vector<8x128xf32>, vector<128x128xf32>, vector<8x128xf32> -> vector<8x128xf32>
    %c3_i32 = arith.constant 3 : i32
    %66 = vector.broadcast %c3_i32 : i32 to vector<8x128xi32>
    %67 = arith.cmpi slt, %6, %66 : vector<8x128xi32>
    %cst_26 = arith.constant 0.000000e+00 : f32
    %68 = vector.broadcast %cst_26 : f32 to vector<8x128xf32>
    %69 = arith.select %67, %65, %68 : vector<8x128xi1>, vector<8x128xf32>
    %cst_27 = arith.constant dense<0.000000e+00> : vector<8xf32>
    %70 = vector.multi_reduction <add>, %69, %cst_27 [1] : vector<8x128xf32> to vector<8xf32>
    %71 = vector.shape_cast %70 : vector<8xf32> to vector<8x1xf32>
    %cst_28 = arith.constant 9.99999996E-13 : f32
    %72 = vector.broadcast %cst_28 : f32 to vector<8x1xf32>
    %73 = arith.maximumf %71, %72 : vector<8x1xf32>
    %cst_29 = arith.constant 1.000000e+00 : f32
    %74 = vector.broadcast %cst_29 : f32 to vector<8x1xf32>
    %75 = arith.divf %74, %73 : vector<8x1xf32>
    %76 = math.log %73 : vector<8x1xf32>
    %77 = vector.broadcast %75 : vector<8x1xf32> to vector<8x128xf32>
    %78 = arith.mulf %65, %77 : vector<8x128xf32>
    %cst_30 = arith.constant 9.99999968E-21 : f32
    %79 = vector.broadcast %cst_30 : f32 to vector<8x128xf32>
    %80 = arith.maximumf %65, %79 : vector<8x128xf32>
    %81 = math.log %80 : vector<8x128xf32>
    %82 = vector.broadcast %76 : vector<8x1xf32> to vector<8x128xf32>
    %83 = arith.subf %81, %82 : vector<8x128xf32>
    %cst_31 = arith.constant -1.000000e+30 : f32
    %84 = vector.broadcast %cst_31 : f32 to vector<8x128xf32>
    %85 = arith.select %67, %65, %84 : vector<8x128xi1>, vector<8x128xf32>
    %cst_32 = arith.constant dense<0xFF800000> : vector<8xf32>
    %86 = vector.multi_reduction <maximumf>, %85, %cst_32 [1] : vector<8x128xf32> to vector<8xf32>
    %87 = vector.shape_cast %86 : vector<8xf32> to vector<8x1xf32>
    %88 = vector.broadcast %87 : vector<8x1xf32> to vector<8x128xf32>
    %89 = arith.cmpf oeq, %65, %88 : vector<8x128xf32>
    %90 = arith.andi %89, %67 : vector<8x128xi1>
    %cst_33 = arith.constant 1.000000e+09 : f32
    %91 = vector.broadcast %cst_33 : f32 to vector<8x128xf32>
    %92 = arith.select %90, %7, %91 : vector<8x128xi1>, vector<8x128xf32>
    %cst_34 = arith.constant dense<0x7F800000> : vector<8xf32>
    %93 = vector.multi_reduction <minimumf>, %92, %cst_34 [1] : vector<8x128xf32> to vector<8xf32>
    %94 = vector.shape_cast %93 : vector<8xf32> to vector<8x1xf32>
    %cst_35 = arith.constant 9.99999968E-21 : f32
    %95 = vector.broadcast %cst_35 : f32 to vector<8x1xf32>
    %96 = arith.maximumf %87, %95 : vector<8x1xf32>
    %97 = math.log %96 : vector<8x1xf32>
    %98 = arith.subf %97, %76 : vector<8x1xf32>
    %99 = arith.mulf %78, %83 : vector<8x128xf32>
    %cst_36 = arith.constant 0.000000e+00 : f32
    %100 = vector.broadcast %cst_36 : f32 to vector<8x128xf32>
    %101 = arith.select %67, %99, %100 : vector<8x128xi1>, vector<8x128xf32>
    %cst_37 = arith.constant dense<0.000000e+00> : vector<8xf32>
    %102 = vector.multi_reduction <add>, %101, %cst_37 [1] : vector<8x128xf32> to vector<8xf32>
    %103 = vector.shape_cast %102 : vector<8xf32> to vector<8x1xf32>
    %cst_38 = arith.constant 0.000000e+00 : f32
    %104 = vector.broadcast %cst_38 : f32 to vector<8x1xf32>
    %105 = arith.subf %104, %103 : vector<8x1xf32>
    %c4_i32 = arith.constant 4 : i32
    %106 = vector.broadcast %c4_i32 : i32 to vector<8x128xi32>
    %107 = arith.cmpi sge, %6, %106 : vector<8x128xi32>
    %c7_i32 = arith.constant 7 : i32
    %108 = vector.broadcast %c7_i32 : i32 to vector<8x128xi32>
    %109 = arith.cmpi slt, %6, %108 : vector<8x128xi32>
    %110 = arith.andi %107, %109 : vector<8x128xi1>
    %111 = arith.select %110, %83, %78 : vector<8x128xi1>, vector<8x128xf32>
    %c3_i32_39 = arith.constant 3 : i32
    %112 = vector.broadcast %c3_i32_39 : i32 to vector<8x128xi32>
    %113 = arith.cmpi eq, %6, %112 : vector<8x128xi32>
    %114 = vector.shape_cast %63 : vector<8x1xf32> to vector<8x1xf32>
    %115 = vector.broadcast %114 : vector<8x1xf32> to vector<8x128xf32>
    %116 = arith.select %113, %115, %111 : vector<8x128xi1>, vector<8x128xf32>
    %c7_i32_40 = arith.constant 7 : i32
    %117 = vector.broadcast %c7_i32_40 : i32 to vector<8x128xi32>
    %118 = arith.cmpi eq, %6, %117 : vector<8x128xi32>
    %119 = vector.shape_cast %94 : vector<8x1xf32> to vector<8x1xf32>
    %120 = vector.broadcast %119 : vector<8x1xf32> to vector<8x128xf32>
    %121 = arith.select %118, %120, %116 : vector<8x128xi1>, vector<8x128xf32>
    %c8_i32 = arith.constant 8 : i32
    %122 = vector.broadcast %c8_i32 : i32 to vector<8x128xi32>
    %123 = arith.cmpi eq, %6, %122 : vector<8x128xi32>
    %124 = vector.shape_cast %98 : vector<8x1xf32> to vector<8x1xf32>
    %125 = vector.broadcast %124 : vector<8x1xf32> to vector<8x128xf32>
    %126 = arith.select %123, %125, %121 : vector<8x128xi1>, vector<8x128xf32>
    %c9_i32 = arith.constant 9 : i32
    %127 = vector.broadcast %c9_i32 : i32 to vector<8x128xi32>
    %128 = arith.cmpi eq, %6, %127 : vector<8x128xi32>
    %129 = vector.shape_cast %105 : vector<8x1xf32> to vector<8x1xf32>
    %130 = vector.broadcast %129 : vector<8x1xf32> to vector<8x128xf32>
    %131 = arith.select %128, %130, %126 : vector<8x128xi1>, vector<8x128xf32>
    %c0_41 = arith.constant 0 : index
    %c0_42 = arith.constant 0 : index
    %132 = vector.load %arg8[%c0_41, %c0_42] : memref<8x128xf32, #tpu.memory_space<vmem>>, vector<8x128xf32>
    tpu.vector_store %arg8[%c0_41, %c0_42], %131 {strides = array<i32>} : memref<8x128xf32, #tpu.memory_space<vmem>>, vector<8x128xf32>,
    return
  }
  func.func @transform_0(%arg0: i32) -> (i32, i32) {
    %c0_i32 = arith.constant 0 : i32
    %c0_i32_0 = arith.constant 0 : i32
    return %arg0, %c0_i32 : i32, i32
  }
  func.func @transform_1(%arg0: i32) -> (i32, i32) {
    %c0_i32 = arith.constant 0 : i32
    %c0_i32_0 = arith.constant 0 : i32
    %c0_i32_1 = arith.constant 0 : i32
    return %c0_i32, %c0_i32_0 : i32, i32
  }
  func.func @transform_2(%arg0: i32) -> (i32, i32) {
    %c0_i32 = arith.constant 0 : i32
    %c0_i32_0 = arith.constant 0 : i32
    %c0_i32_1 = arith.constant 0 : i32
    return %c0_i32, %c0_i32_0 : i32, i32
  }
  func.func @transform_3(%arg0: i32) -> (i32, i32) {
    %c0_i32 = arith.constant 0 : i32
    %c0_i32_0 = arith.constant 0 : i32
    %c0_i32_1 = arith.constant 0 : i32
    return %c0_i32, %c0_i32_0 : i32, i32
  }
  func.func @transform_4(%arg0: i32) -> (i32, i32) {
    %c0_i32 = arith.constant 0 : i32
    %c0_i32_0 = arith.constant 0 : i32
    %c0_i32_1 = arith.constant 0 : i32
    return %c0_i32, %c0_i32_0 : i32, i32
  }
  func.func @transform_5(%arg0: i32) -> (i32, i32) {
    %c0_i32 = arith.constant 0 : i32
    %c0_i32_0 = arith.constant 0 : i32
    %c0_i32_1 = arith.constant 0 : i32
    return %c0_i32, %c0_i32_0 : i32, i32
  }
  func.func @transform_6(%arg0: i32) -> (i32, i32) {
    %c0_i32 = arith.constant 0 : i32
    %c0_i32_0 = arith.constant 0 : i32
    %c0_i32_1 = arith.constant 0 : i32
    return %c0_i32, %c0_i32_0 : i32, i32
  }
  func.func @transform_7(%arg0: i32) -> (i32, i32) {
    %c0_i32 = arith.constant 0 : i32
    %c0_i32_0 = arith.constant 0 : i32
    return %arg0, %c0_i32 : i32, i32
  }
}

</mosaic_0001>

<bundles_post_ra>
// kernel: fused_forward.1
= control target key start
LH: loop header
LB: loop body
LE: loop exit
PB: predicated region body
PF: predicated region fallthrough
CT: control target
= control target key end

     0   :  { %s1330_s0 = inlined_call_operand.vmem [shape: f32[8,24], index: 0, kind: input, shape index: {}]   ;;  %s1331_s1 = inlined_call_operand.hbm [shape: f32[24,128], index: 1, kind: input, shape index: {}]   ;;  %s1332_s2 = inlined_call_operand.vmem [shape: f32[1,128], index: 2, kind: input, shape index: {}]   ;;  %s1333_s3 = inlined_call_operand.hbm [shape: f32[128,128], index: 3, kind: input, shape index: {}]   ;;  %s1334_s4 = inlined_call_operand.hbm [shape: f32[128,128], index: 4, kind: input, shape index: {}]   ;;  %s1335_s5 = inlined_call_operand.vmem [shape: f32[1,128], index: 5, kind: input, shape index: {}]   ;;  %s1336_s6 = inlined_call_operand.<no memory space> [shape: f32[1,1], index: 6, kind: input, shape index: {}]   ;;  %s1337_s7 = inlined_call_operand.vmem [shape: f32[8,128], index: 7, kind: output, shape index: {}]  }
   0x1   :  { %v12_v0 = vstv %s1336_s6 }
   0x2   :  { %13 = vst [vmem:[#allocation2] sm:$0x1] %v12_v0 }
   0x3   :  { %14 = vsyncpa [#allocation4], 0 }
   0x4   :  { %15 = vsyncpa [#allocation6], 0  ;;  %s1042_s26 = smov [#allocation5]   ;;  %s1043_s28 = smov [#allocation3]  }
   0x5   :  { %s37_s27 = sshll.u32 %s1042_s26, 4  ;;  %s23_s29 = sshll.u32 %s1043_s28, 4  ;;  %s38_s27 = int_to_ptr.vmem [resolvable:$true] %s37_s27  ;;  %s24_s29 = int_to_ptr.vmem [resolvable:$true] %s23_s29 }
   0x6   :  { %s986_s30 = scalar_lea.vmem %s38_s27, 2048  ;;  %p991_p1 = scmp.lt.s32.totalorder %s38_s27, %s38_s27 }
   0x7   :  { %p987_p0 = scmp.ne.s32.totalorder %s38_s27, %s986_s30  ;;  %p992_p2 = scmp.lt.s32.totalorder %s986_s30, %s986_s30 }
   0x9   :  { %p993_p3 = por %p992_p2, %p991_p1 }
   0xb   :  { %p994_p4 = pnand %p993_p3, %p987_p0 }
   0xd   :  { %997 = shalt.err (!%p994_p4)
}
   0xe   :  { %s1044_s8 = smov 128   ;;  %s1045_s9 = smov 8  }
   0xf   :  { %43 = dma.hbm_to_vmem [thread:$0]  %s1333_s3, 2048, %s38_s27, [#allocation6], %s1044_s8, %s1044_s8, %s1045_s9  }
  0x10   :  { %s1006_s11 = scalar_lea.vmem %s24_s29, 384  ;;  %p1011_p6 = scmp.lt.s32.totalorder %s24_s29, %s24_s29 }
  0x11   :  { %p1007_p5 = scmp.ne.s32.totalorder %s24_s29, %s1006_s11  ;;  %p1012_p7 = scmp.lt.s32.totalorder %s1006_s11, %s1006_s11 }
  0x13   :  { %p1013_p8 = por %p1012_p7, %p1011_p6 }
  0x15   :  { %p1014_p9 = pnand %p1013_p8, %p1007_p5 }
  0x17   :  { %1017 = shalt.err (!%p1014_p9)
}
  0x18   :  { %29 = dma.hbm_to_vmem [thread:$0]  %s1331_s1, 384, %s24_s29, [#allocation4], %s1044_s8, %s1044_s8, %s1045_s9  }
  0x19   :  { %s1046_s14 = smov [#allocation7]  }
  0x1a   :  { %s49_s15 = sshll.u32 %s1046_s14, 4  ;;  %s50_s15 = int_to_ptr.vmem [resolvable:$true] %s49_s15 }
  0x1b   :  { %s1026_s16 = scalar_lea.vmem %s50_s15, 2048  ;;  %p1031_p11 = scmp.lt.s32.totalorder %s50_s15, %s50_s15 }
  0x1c   :  { %p1027_p10 = scmp.ne.s32.totalorder %s50_s15, %s1026_s16  ;;  %p1032_p12 = scmp.lt.s32.totalorder %s1026_s16, %s1026_s16 }
  0x1e   :  { %p1033_p13 = por %p1032_p12, %p1031_p11 }
  0x20   :  { %p1034_p0 = pnand %p1033_p13, %p1027_p10 }
  0x22   :  { %1037 = shalt.err (!%p1034_p0)
}
  0x23   :  { %55 = dma.hbm_to_vmem [thread:$0]  %s1334_s4, 2048, %s50_s15, [#allocation6], %s1044_s8, %s1044_s8, %s1045_s9  }
  0x24   :  { %1038 = dma.done.wait [#allocation4], 384  }
  0x25   :  { %1039 = vsyncadd [#allocation4], 4294966912 }
  0x26   :  { %1040 = dma.done.wait [#allocation6], 4096  }
  0x27   :  { %1041 = vsyncadd [#allocation6], 4294963200  ;;  %v1047_v1 = vmov 0.0   ;;  %vm1048_vm0 = vmmov 0   ;;  %v72_v2 = vld [vmem:[#allocation3 + $0x10] sm:$0xff]  ;;  %v71_v3 = vld [vmem:[#allocation3 + $0x8] sm:$0xff]  ;;  %v154_v32 = vlaneseq }
  0x28   :  { %756 = vmatprep.subr.mxu0 %v1047_v1  ;;  %762 = vmatprep.mubr.msk.f32.mxu0 %vm1048_vm0, %v1047_v1  ;;  %v70_v4 = vld [vmem:[#allocation3] sm:$0xff]  ;;  %vm80_vm1 = vcmask 195584   ;;  %v1116_v6 = vld [vmem:[#allocation5 + $0x78] sm:$0xff]  ;;  %v1121_v7 = vld [vmem:[#allocation5 + $0x70] sm:$0xff] }
  0x29   :  { %765 = vmatprep.subr.mxu1 %v1047_v1  ;;  %797 = vmatprep.mubr.msk.f32.mxu1 %vm1048_vm0, %v1047_v1  ;;  %v69_v5 = vld [vmem:[%s1330_s0] sm:$0xff]  ;;  %v1139_v10 = vld [vmem:[#allocation5 + $0x58] sm:$0xff]  ;;  %v1145_v11 = vld [vmem:[#allocation5 + $0x50] sm:$0xff]  ;;  %v1218_v33 = vand.u32 127, %v154_v32 }
  0x2a   :  { %757 = vmatpush3.msra.mxu0 %v72_v2  ;;  %766 = vmatpush3.msra.mxu1 %v1116_v6  ;;  %v1127_v8 = vld [vmem:[#allocation5 + $0x68] sm:$0xff]  ;;  %v1133_v9 = vld [vmem:[#allocation5 + $0x60] sm:$0xff]  ;;  %v1163_v14 = vld [vmem:[#allocation5 + $0x38] sm:$0xff] }
  0x2b   :  { %758 = vmatprep.subr.mxu0 %v1047_v1  ;;  %767 = vmatprep.subr.mxu1 %v1047_v1  ;;  %v1151_v12 = vld [vmem:[#allocation5 + $0x48] sm:$0xff]  ;;  %v1157_v13 = vld [vmem:[#allocation5 + $0x40] sm:$0xff]  ;;  %v1169_v15 = vld [vmem:[#allocation5 + $0x30] sm:$0xff]  ;;  %vm157_vm2 = vcmp.lt.s32.totalorder %v1218_v33, 64  ;;  %vm602_vm3 = vcmp.lt.s32.totalorder %v1218_v33, 3  ;;  %v156_v32 = vcvt.s32.f32 %v1218_v33  ;;  %vm633_vm6 = vcmp.ge.s32.totalorder %v1218_v33, 4 }
  0x2c   :  { %759 = vmatpush3.msra.mxu0 %v71_v3  ;;  %768 = vmatpush3.msra.mxu1 %v1121_v7  ;;  %v1171_v16 = vld [vmem:[#allocation5 + $0x28] sm:$0xff]  ;;  %v1177_v17 = vld [vmem:[#allocation5 + $0x20] sm:$0xff]  ;;  %v1183_v18 = vld [vmem:[#allocation5 + $0x18] sm:$0xff]  ;;  %vm634_vm7 = vcmp.lt.s32.totalorder %v1218_v33, 7  ;;  %vm637_vm9 = vcmp.eq.s32.totalorder %v1218_v33, 3  ;;  %vm644_vm10 = vcmp.eq.s32.totalorder %v1218_v33, 7 }
  0x2d   :  { %760 = vmatprep.subr.mxu0 %v1047_v1  ;;  %769 = vmatprep.subr.mxu1 %v1047_v1  ;;  %v1189_v19 = vld [vmem:[#allocation5 + $0x10] sm:$0xff]  ;;  %v1195_v20 = vld [vmem:[#allocation5 + $0x8] sm:$0xff]  ;;  %v1201_v21 = vld [vmem:[#allocation5] sm:$0xff]  ;;  %vm646_vm11 = vcmp.eq.s32.totalorder %v1218_v33, 8  ;;  %vm648_vm12 = vcmp.eq.s32.totalorder %v1218_v33, 9 }
  0x2e   :  { %761 = vmatpush3.msra.mxu0 %v70_v4  ;;  %770 = vmatpush3.msra.mxu1 %v1127_v8  ;;  %v657_v22 = vld [vmem:[%s1332_s2] ss:$0 sm:$0xff]  ;;  %v531_v63 = vld [vmem:[#allocation7 + $0x78] sm:$0xff]  ;;  %v530_v0 = vld [vmem:[#allocation7 + $0x70] sm:$0xff] }
  0x2f   :  { %763 = vmatmul.mubr.msk.f32.vlgmr.msra.gmra.mxu0 %vm80_vm1, %v69_v5  ;;  %800 = vmatprep.subr.mxu0 %v1047_v1  ;;  %v665_v26 = vld [vmem:[%s1335_s5] ss:$0 sm:$0xff]  ;;  %v529_v2 = vld [vmem:[#allocation7 + $0x68] sm:$0xff]  ;;  %v527_v4 = vld [vmem:[#allocation7 + $0x58] sm:$0xff] }
  0x30   :  { %832 = vmatprep.mubr.msk.f32.mxu0 %vm1048_vm0, %v1047_v1  ;;  %801 = vmatpush3.msra.mxu0 %v1116_v6  ;;  %v528_v3 = vld [vmem:[#allocation7 + $0x60] sm:$0xff]  ;;  %v526_v5 = vld [vmem:[#allocation7 + $0x50] sm:$0xff]  ;;  %vm1315_vm8 = vmand %vm633_vm6, %vm634_vm7 }
  0x31   :  { %802 = vmatprep.subr.mxu0 %v1047_v1  ;;  %771 = vmatprep.subr.mxu1 %v1047_v1 }
  0x32   :  { %803 = vmatpush3.msra.mxu0 %v1121_v7  ;;  %772 = vmatpush3.msra.mxu1 %v1133_v9 }
  0x33   :  { %804 = vmatprep.subr.mxu0 %v1047_v1  ;;  %773 = vmatprep.subr.mxu1 %v1047_v1 }
  0x34   :  { %805 = vmatpush3.msra.mxu0 %v1127_v8  ;;  %774 = vmatpush3.msra.mxu1 %v1139_v10 }
  0x35   :  { %806 = vmatprep.subr.mxu0 %v1047_v1  ;;  %775 = vmatprep.subr.mxu1 %v1047_v1 }
  0x36   :  { %807 = vmatpush3.msra.mxu0 %v1133_v9  ;;  %776 = vmatpush3.msra.mxu1 %v1145_v11 }
  0x37   :  { %808 = vmatprep.subr.mxu0 %v1047_v1  ;;  %777 = vmatprep.subr.mxu1 %v1047_v1 }
  0x38   :  { %809 = vmatpush3.msra.mxu0 %v1139_v10  ;;  %778 = vmatpush3.msra.mxu1 %v1151_v12 }
  0x39   :  { %810 = vmatprep.subr.mxu0 %v1047_v1  ;;  %779 = vmatprep.subr.mxu1 %v1047_v1 }
  0x3a   :  { %811 = vmatpush3.msra.mxu0 %v1145_v11  ;;  %780 = vmatpush3.msra.mxu1 %v1157_v13 }
  0x3b   :  { %812 = vmatprep.subr.mxu0 %v1047_v1  ;;  %781 = vmatprep.subr.mxu1 %v1047_v1 }
  0x3c   :  { %813 = vmatpush3.msra.mxu0 %v1151_v12  ;;  %782 = vmatpush3.msra.mxu1 %v1163_v14 }
  0x3d   :  { %814 = vmatprep.subr.mxu0 %v1047_v1  ;;  %783 = vmatprep.subr.mxu1 %v1047_v1 }
  0x3e   :  { %815 = vmatpush3.msra.mxu0 %v1157_v13  ;;  %784 = vmatpush3.msra.mxu1 %v1169_v15 }
  0x3f   :  { %816 = vmatprep.subr.mxu0 %v1047_v1  ;;  %785 = vmatprep.subr.mxu1 %v1047_v1 }
  0x40   :  { %817 = vmatpush3.msra.mxu0 %v1163_v14  ;;  %786 = vmatpush3.msra.mxu1 %v1171_v16 }
  0x41   :  { %818 = vmatprep.subr.mxu0 %v1047_v1  ;;  %787 = vmatprep.subr.mxu1 %v1047_v1 }
  0x42   :  { %819 = vmatpush3.msra.mxu0 %v1169_v15  ;;  %788 = vmatpush3.msra.mxu1 %v1177_v17 }
  0x43   :  { %820 = vmatprep.subr.mxu0 %v1047_v1  ;;  %789 = vmatprep.subr.mxu1 %v1047_v1 }
  0x44   :  { %821 = vmatpush3.msra.mxu0 %v1171_v16  ;;  %790 = vmatpush3.msra.mxu1 %v1183_v18 }
  0x45   :  { %822 = vmatprep.subr.mxu0 %v1047_v1  ;;  %791 = vmatprep.subr.mxu1 %v1047_v1 }
  0x46   :  { %823 = vmatpush3.msra.mxu0 %v1177_v17  ;;  %792 = vmatpush3.msra.mxu1 %v1189_v19 }
  0x47   :  { %824 = vmatprep.subr.mxu0 %v1047_v1  ;;  %793 = vmatprep.subr.mxu1 %v1047_v1 }
  0x48   :  { %825 = vmatpush3.msra.mxu0 %v1183_v18  ;;  %794 = vmatpush3.msra.mxu1 %v1195_v20 }
  0x49   :  { %826 = vmatprep.subr.mxu0 %v1047_v1  ;;  %795 = vmatprep.subr.mxu1 %v1047_v1 }
  0x4a   :  { %827 = vmatpush3.msra.mxu0 %v1189_v19  ;;  %796 = vmatpush3.msra.mxu1 %v1201_v21 }
  0x4b   :  { %828 = vmatprep.subr.mxu0 %v1047_v1  ;;  %835 = vmatprep.subr.mxu1 %v1047_v1 }
  0x4c   :  { %829 = vmatpush3.msra.mxu0 %v1195_v20 }
  0x4d   :  { %830 = vmatprep.subr.mxu0 %v1047_v1 }
  0x4e   :  { %831 = vmatpush3.msra.mxu0 %v1201_v21 }
  0x4f   :  { %870 = vmatprep.subr.mxu0 %v1047_v1 }
  0xef   :  { %v150_v23 = vpop.f32.mrf.mxu0 }
  0xf0   :  { %v151_v24 = vadd.f32 %v657_v22, %v150_v23 }
  0xf1   :  { %v764_v25 = vpop.f32.mrf.mxu0 }
  0xf2   :  { %v659_v27 = vmul.f32 -1.442695, %v151_v24  ;;  %v497_v28 = vmax.f32 %v151_v24, 0.0 }
  0xf4   :  { %950 = vpow2.f32 %v659_v27  ;;  %v505_v29 = vmul.f32 %v665_v26, %v497_v28  ;;  %v1049_v28 = vmov 0  }
  0xf5   :  { %948 = vset.pattern.permute.xlu1 %v1049_v28  ;;  %949 = vset.pattern.permute.xlu0 %v1049_v28 }
  0xf6   :  { %506 = vadd.xlane.f32.xlu1 %v505_v29 }
 0x101   :  { %v951_v30 = vpop.eup %950 }
 0x102   :  { %v161_v31 = vadd.f32 1.0, %v951_v30 }
 0x104   :  { %952 = vrcp.f32 %v161_v31 }
 0x111   :  { %v953_v34 = vpop.eup %952 }
 0x112   :  { %v164_v35 = vsel %vm157_vm2, %v953_v34, 0.0  ;;  %798 = vmatmul.mubr.msk.f32.vlgmr.msra.gmra.mxu1 %vm157_vm2, %v953_v34 }
 0x113   :  { %836 = vmatpush3.msra.mxu1 %v1116_v6  ;;  %867 = vmatprep.mubr.msk.f32.mxu1 %vm1048_vm0, %v1047_v1 }
 0x114   :  { %837 = vmatprep.subr.mxu1 %v1047_v1 }
 0x115   :  { %838 = vmatpush3.msra.mxu1 %v1121_v7 }
 0x116   :  { %839 = vmatprep.subr.mxu1 %v1047_v1 }
 0x117   :  { %840 = vmatpush3.msra.mxu1 %v1127_v8 }
 0x118   :  { %841 = vmatprep.subr.mxu1 %v1047_v1 }
 0x119   :  { %842 = vmatpush3.msra.mxu1 %v1133_v9 }
 0x11a   :  { %843 = vmatprep.subr.mxu1 %v1047_v1 }
 0x11b   :  { %844 = vmatpush3.msra.mxu1 %v1139_v10 }
 0x11c   :  { %845 = vmatprep.subr.mxu1 %v1047_v1 }
 0x11d   :  { %846 = vmatpush3.msra.mxu1 %v1145_v11 }
 0x11e   :  { %847 = vmatprep.subr.mxu1 %v1047_v1 }
 0x11f   :  { %848 = vmatpush3.msra.mxu1 %v1151_v12 }
 0x120   :  { %849 = vmatprep.subr.mxu1 %v1047_v1 }
 0x121   :  { %850 = vmatpush3.msra.mxu1 %v1157_v13 }
 0x122   :  { %851 = vmatprep.subr.mxu1 %v1047_v1 }
 0x123   :  { %852 = vmatpush3.msra.mxu1 %v1163_v14 }
 0x124   :  { %853 = vmatprep.subr.mxu1 %v1047_v1 }
 0x125   :  { %854 = vmatpush3.msra.mxu1 %v1169_v15 }
 0x126   :  { %855 = vmatprep.subr.mxu1 %v1047_v1 }
 0x127   :  { %856 = vmatpush3.msra.mxu1 %v1171_v16 }
 0x128   :  { %857 = vmatprep.subr.mxu1 %v1047_v1 }
 0x129   :  { %858 = vmatpush3.msra.mxu1 %v1177_v17 }
 0x12a   :  { %859 = vmatprep.subr.mxu1 %v1047_v1 }
 0x12b   :  { %860 = vmatpush3.msra.mxu1 %v1183_v18 }
 0x12c   :  { %861 = vmatprep.subr.mxu1 %v1047_v1 }
 0x12d   :  { %862 = vmatpush3.msra.mxu1 %v1189_v19 }
 0x12e   :  { %863 = vmatprep.subr.mxu1 %v1047_v1 }
 0x12f   :  { %864 = vmatpush3.msra.mxu1 %v1195_v20 }
 0x130   :  { %865 = vmatprep.subr.mxu1 %v1047_v1 }
 0x131   :  { %866 = vmatpush3.msra.mxu1 %v1201_v21 }
 0x132   :  { %905 = vmatprep.subr.mxu1 %v1047_v1 }
 0x1d2   :  { %v247_v36 = vpop.f32.mrf.mxu1 }
 0x1d3   :  { %v661_v37 = vmul.f32 -1.442695, %v247_v36 }
 0x1d4   :  { %v799_v38 = vpop.f32.mrf.mxu1 }
 0x1d5   :  { %954 = vpow2.f32 %v661_v37 }
 0x1e2   :  { %v955_v39 = vpop.eup %954 }
 0x1e3   :  { %v254_v40 = vadd.f32 1.0, %v955_v39 }
 0x1e5   :  { %956 = vrcp.f32 %v254_v40 }
 0x1f2   :  { %v957_v41 = vpop.eup %956 }
 0x1f3   :  { %v257_v42 = vadd.f32 %v957_v41, %v164_v35  ;;  %v258_v43 = vmul.f32 %v957_v41, %v164_v35 }
 0x1f5   :  { %v259_v44 = vsub.f32 %v257_v42, %v258_v43  ;;  %v666_v42 = vld [vmem:[#allocation2] ss:$0 sm:$0xff]  ;;  %v507_v43 = vpop.xlane.xlu1 %506 }
 0x1f7   :  { %833 = vmatmul.mubr.f32.vlgmr.msra.gmra.mxu0 %v259_v44 }
 0x1f8   :  { %871 = vmatpush3.msra.mxu0 %v1116_v6  ;;  %902 = vmatprep.mubr.msk.f32.mxu0 %vm1048_vm0, %v1047_v1  ;;  %v525_v6 = vld [vmem:[#allocation7 + $0x48] sm:$0xff] }
 0x1f9   :  { %872 = vmatprep.subr.mxu0 %v1047_v1 }
 0x1fa   :  { %873 = vmatpush3.msra.mxu0 %v1121_v7  ;;  %v524_v7 = vld [vmem:[#allocation7 + $0x40] sm:$0xff] }
 0x1fb   :  { %874 = vmatprep.subr.mxu0 %v1047_v1 }
 0x1fc   :  { %875 = vmatpush3.msra.mxu0 %v1127_v8  ;;  %v523_v8 = vld [vmem:[#allocation7 + $0x38] sm:$0xff] }
 0x1fd   :  { %876 = vmatprep.subr.mxu0 %v1047_v1 }
 0x1fe   :  { %877 = vmatpush3.msra.mxu0 %v1133_v9  ;;  %v522_v9 = vld [vmem:[#allocation7 + $0x30] sm:$0xff] }
 0x1ff   :  { %878 = vmatprep.subr.mxu0 %v1047_v1 }
 0x200   :  { %879 = vmatpush3.msra.mxu0 %v1139_v10  ;;  %v521_v10 = vld [vmem:[#allocation7 + $0x28] sm:$0xff] }
 0x201   :  { %880 = vmatprep.subr.mxu0 %v1047_v1 }
 0x202   :  { %881 = vmatpush3.msra.mxu0 %v1145_v11  ;;  %v520_v11 = vld [vmem:[#allocation7 + $0x20] sm:$0xff] }
 0x203   :  { %882 = vmatprep.subr.mxu0 %v1047_v1 }
 0x204   :  { %883 = vmatpush3.msra.mxu0 %v1151_v12  ;;  %v519_v12 = vld [vmem:[#allocation7 + $0x18] sm:$0xff] }
 0x205   :  { %884 = vmatprep.subr.mxu0 %v1047_v1 }
 0x206   :  { %885 = vmatpush3.msra.mxu0 %v1157_v13  ;;  %v518_v13 = vld [vmem:[#allocation7 + $0x10] sm:$0xff] }
 0x207   :  { %886 = vmatprep.subr.mxu0 %v1047_v1 }
 0x208   :  { %887 = vmatpush3.msra.mxu0 %v1163_v14  ;;  %v517_v14 = vld [vmem:[#allocation7 + $0x8] sm:$0xff] }
 0x209   :  { %888 = vmatprep.subr.mxu0 %v1047_v1 }
 0x20a   :  { %889 = vmatpush3.msra.mxu0 %v1169_v15  ;;  %v516_v15 = vld [vmem:[#allocation7] sm:$0xff] }
 0x20b   :  { %890 = vmatprep.subr.mxu0 %v1047_v1 }
 0x20c   :  { %891 = vmatpush3.msra.mxu0 %v1171_v16 }
 0x20d   :  { %892 = vmatprep.subr.mxu0 %v1047_v1 }
 0x20e   :  { %893 = vmatpush3.msra.mxu0 %v1177_v17 }
 0x20f   :  { %894 = vmatprep.subr.mxu0 %v1047_v1 }
 0x210   :  { %895 = vmatpush3.msra.mxu0 %v1183_v18 }
 0x211   :  { %896 = vmatprep.subr.mxu0 %v1047_v1 }
 0x212   :  { %897 = vmatpush3.msra.mxu0 %v1189_v19 }
 0x213   :  { %898 = vmatprep.subr.mxu0 %v1047_v1 }
 0x214   :  { %899 = vmatpush3.msra.mxu0 %v1195_v20 }
 0x215   :  { %900 = vmatprep.subr.mxu0 %v1047_v1 }
 0x216   :  { %901 = vmatpush3.msra.mxu0 %v1201_v21 }
 0x2b7   :  { %v326_v45 = vpop.f32.mrf.mxu0 }
 0x2b8   :  { %v662_v46 = vmul.f32 -1.442695, %v326_v45 }
 0x2b9   :  { %v834_v47 = vpop.f32.mrf.mxu0 }
 0x2ba   :  { %958 = vpow2.f32 %v662_v46 }
 0x2c7   :  { %v959_v48 = vpop.eup %958 }
 0x2c8   :  { %v333_v49 = vadd.f32 1.0, %v959_v48  ;;  %v515_v48 = vadd.f32 %v666_v42, %v507_v43 }
 0x2ca   :  { %960 = vrcp.f32 %v333_v49 }
 0x2d7   :  { %v961_v50 = vpop.eup %960 }
 0x2d8   :  { %v336_v51 = vadd.f32 %v961_v50, %v259_v44  ;;  %v337_v52 = vmul.f32 %v961_v50, %v259_v44 }
 0x2da   :  { %v338_v53 = vsub.f32 %v336_v51, %v337_v52 }
 0x2dc   :  { %868 = vmatmul.mubr.f32.vlgmr.msra.gmra.mxu1 %v338_v53 }
 0x2dd   :  { %937 = vmatprep.mubr.msk.f32.mxu1 %vm1048_vm0, %v1047_v1  ;;  %906 = vmatpush3.msra.mxu1 %v531_v63 }
 0x2de   :  { %907 = vmatprep.subr.mxu1 %v1047_v1 }
 0x2df   :  { %908 = vmatpush3.msra.mxu1 %v530_v0 }
 0x2e0   :  { %909 = vmatprep.subr.mxu1 %v1047_v1 }
 0x2e1   :  { %910 = vmatpush3.msra.mxu1 %v529_v2 }
 0x2e2   :  { %911 = vmatprep.subr.mxu1 %v1047_v1 }
 0x2e3   :  { %912 = vmatpush3.msra.mxu1 %v528_v3 }
 0x2e4   :  { %913 = vmatprep.subr.mxu1 %v1047_v1 }
 0x2e5   :  { %914 = vmatpush3.msra.mxu1 %v527_v4 }
 0x2e6   :  { %915 = vmatprep.subr.mxu1 %v1047_v1 }
 0x2e7   :  { %916 = vmatpush3.msra.mxu1 %v526_v5 }
 0x2e8   :  { %917 = vmatprep.subr.mxu1 %v1047_v1 }
 0x2e9   :  { %918 = vmatpush3.msra.mxu1 %v525_v6 }
 0x2ea   :  { %919 = vmatprep.subr.mxu1 %v1047_v1 }
 0x2eb   :  { %920 = vmatpush3.msra.mxu1 %v524_v7 }
 0x2ec   :  { %921 = vmatprep.subr.mxu1 %v1047_v1 }
 0x2ed   :  { %922 = vmatpush3.msra.mxu1 %v523_v8 }
 0x2ee   :  { %923 = vmatprep.subr.mxu1 %v1047_v1 }
 0x2ef   :  { %924 = vmatpush3.msra.mxu1 %v522_v9 }
 0x2f0   :  { %925 = vmatprep.subr.mxu1 %v1047_v1 }
 0x2f1   :  { %926 = vmatpush3.msra.mxu1 %v521_v10 }
 0x2f2   :  { %927 = vmatprep.subr.mxu1 %v1047_v1 }
 0x2f3   :  { %928 = vmatpush3.msra.mxu1 %v520_v11 }
 0x2f4   :  { %929 = vmatprep.subr.mxu1 %v1047_v1 }
 0x2f5   :  { %930 = vmatpush3.msra.mxu1 %v519_v12 }
 0x2f6   :  { %931 = vmatprep.subr.mxu1 %v1047_v1 }
 0x2f7   :  { %932 = vmatpush3.msra.mxu1 %v518_v13 }
 0x2f8   :  { %933 = vmatprep.subr.mxu1 %v1047_v1 }
 0x2f9   :  { %934 = vmatpush3.msra.mxu1 %v517_v14 }
 0x2fa   :  { %935 = vmatprep.subr.mxu1 %v1047_v1 }
 0x2fb   :  { %936 = vmatpush3.msra.mxu1 %v516_v15 }
 0x39c   :  { %v405_v54 = vpop.f32.mrf.mxu1 }
 0x39d   :  { %v663_v55 = vmul.f32 -1.442695, %v405_v54 }
 0x39e   :  { %v869_v56 = vpop.f32.mrf.mxu1 }
 0x39f   :  { %962 = vpow2.f32 %v663_v55 }
 0x3ac   :  { %v963_v57 = vpop.eup %962 }
 0x3ad   :  { %v412_v58 = vadd.f32 1.0, %v963_v57 }
 0x3af   :  { %964 = vrcp.f32 %v412_v58 }
 0x3bc   :  { %v965_v59 = vpop.eup %964 }
 0x3bd   :  { %v415_v60 = vadd.f32 %v965_v59, %v338_v53  ;;  %v416_v61 = vmul.f32 %v965_v59, %v338_v53 }
 0x3bf   :  { %v417_v62 = vsub.f32 %v415_v60, %v416_v61 }
 0x3c1   :  { %903 = vmatmul.mubr.f32.vlgmr.msra.gmra.mxu0 %v417_v62 }
 0x481   :  { %v484_v16 = vpop.f32.mrf.mxu0 }
 0x482   :  { %v664_v17 = vmul.f32 -1.442695, %v484_v16 }
 0x483   :  { %v904_v18 = vpop.f32.mrf.mxu0 }
 0x484   :  { %966 = vpow2.f32 %v664_v17 }
 0x491   :  { %v967_v19 = vpop.eup %966 }
 0x492   :  { %v491_v20 = vadd.f32 1.0, %v967_v19 }
 0x494   :  { %968 = vrcp.f32 %v491_v20 }
 0x4a1   :  { %v969_v21 = vpop.eup %968 }
 0x4a2   :  { %v494_v22 = vadd.f32 %v969_v21, %v417_v62  ;;  %v495_v23 = vmul.f32 %v969_v21, %v417_v62 }
 0x4a4   :  { %v496_v24 = vsub.f32 %v494_v22, %v495_v23 }
 0x4a6   :  { %938 = vmatmul.mubr.f32.vlgmr.msra.gmra.mxu1 %v496_v24 }
 0x566   :  { %v598_v25 = vpop.f32.mrf.mxu1 }
 0x567   :  { %v603_v26 = vsel %vm602_vm3, %v598_v25, 0.0  ;;  %v616_v27 = vsel %vm602_vm3, %v598_v25, -1e+30  ;;  %v612_v29 = vmax.f32 %v598_v25, 1e-20 }
 0x568   :  { %604 = vadd.xlane.f32.xlu0 %v603_v26  ;;  %v939_v1 = vpop.f32.mrf.mxu1 }
 0x569   :  { %970 = vlog2.f32 %v612_v29 }
 0x56c   :  { %617 = vmax.xlane.f32.xlu0 %v616_v27 }
 0x576   :  { %v971_v36 = vpop.eup %970 }
 0x577   :  { %v614_v40 = vmul.f32 0.6931472, %v971_v36 }
 0x5f1   :  { %v605_v30 = vpop.xlane.xlu0 %604 }
 0x5f2   :  { %v606_v31 = vmax.f32 %v605_v30, 1e-12 }
 0x5f4   :  { %972 = vrcp.f32 %v606_v31 }
 0x5f5   :  { %974 = vlog2.f32 %v606_v31  ;;  %v618_v34 = vpop.xlane.xlu0 %617 }
 0x5f6   :  { %vm619_vm4 = vcmp.eq.f32.partialorder %v598_v25, %v618_v34  ;;  %v624_v50 = vmax.f32 %v618_v34, 1e-20 }
 0x5f7   :  { %vm620_vm5 = vmand %vm619_vm4, %vm602_vm3 }
 0x5f8   :  { %v621_v35 = vsel %vm620_vm5, %v156_v32, 1e+09  ;;  %976 = vlog2.f32 %v624_v50 }
 0x5f9   :  { %622 = vmin.xlane.f32.xlu1 %v621_v35 }
 0x601   :  { %v973_v37 = vpop.eup %972 }
 0x602   :  { %v975_v38 = vpop.eup %974  ;;  %v611_v44 = vmul.f32 %v973_v37, %v598_v25 }
 0x603   :  { %v610_v39 = vmul.f32 0.6931472, %v975_v38 }
 0x605   :  { %v615_v45 = vsub.f32 %v614_v40, %v610_v39  ;;  %v977_v51 = vpop.eup %976 }
 0x606   :  { %v626_v53 = vmul.f32 0.6931472, %v977_v51 }
 0x607   :  { %v628_v46 = vmul.f32 %v615_v45, %v611_v44  ;;  %v636_v47 = vsel %vm1315_vm8, %v615_v45, %v611_v44 }
 0x608   :  { %v627_v55 = vsub.f32 %v626_v53, %v610_v39 }
 0x609   :  { %v629_v49 = vsel %vm602_vm3, %v628_v46, 0.0 }
 0x60a   :  { %630 = vadd.xlane.f32.xlu0 %v629_v49  ;;  %640 = vperm.xlu1 %948, %v515_v48  }
 0x682   :  { %v623_v52 = vpop.xlane.xlu1 %622 }
 0x686   :  { %v641_v54 = vpop.permute.xlu1 %640 }
 0x687   :  { %v643_v56 = vsel %vm637_vm9, %v641_v54, %v636_v47 }
 0x688   :  { %v645_v57 = vsel %vm644_vm10, %v623_v52, %v643_v56 }
 0x689   :  { %v647_v58 = vsel %vm646_vm11, %v627_v55, %v645_v57 }
 0x693   :  { %v631_v59 = vpop.xlane.xlu0 %630 }
 0x694   :  { %v632_v60 = vsub.f32 0.0, %v631_v59 }
 0x696   :  { %v649_v61 = vsel %vm648_vm12, %v632_v60, %v647_v58 }
 0x697   :  { %650 = vst [vmem:[%s1337_s7] sm:$0xff] %v649_v61 }
 0x698   :  { %655 = vsyncpa [#allocation4], 1 }
 0x699   :  { %656 = vsyncpa [#allocation6], 1 }

</bundles_post_ra>
